<compile_context>
chip_gen: v6e
topology: v6e:2x2x1
jax: 0.10.0
libtpu: 0.0.40
codegen_flags: <defaults>
</compile_context>

<pallas_src>
import numpy as np

import jax
import jax.numpy as jnp
from jax import lax
from jax.experimental import pallas as pl
from jax.experimental.pallas import tpu as pltpu


def _ceil_to(a, m):
    return ((a + m - 1) // m) * m


def _make_length_regulator_kernel(t_tile, s):
    def kernel(cum_ref, dur_ref, x_ref, o_ref):
        # cum_ref: (1, 1, S) int32  inclusive cumsum of durations for batch b
        # dur_ref: (1, 1, S) int32  durations for batch b
        # x_ref:   (1, S, H)        encoder frames for batch b
        # o_ref:   (1, t_tile, H)   expanded mel-frame tile
        ti = pl.program_id(1)
        t0 = ti * t_tile

        t_ids = t0 + lax.broadcasted_iota(jnp.int32, (t_tile, s), 0)  # (T_t, S)
        cum_incl = cum_ref[0]                                          # (1, S)
        cum_excl = cum_incl - dur_ref[0]                               # (1, S)

        # sel[t, s] == 1  iff output frame t is a copy of source frame s.
        # Frames past mel_len[b] select nothing -> rows of zeros (= padding).
        sel = jnp.logical_and(t_ids >= cum_excl, t_ids < cum_incl)

        x_blk = x_ref[0]                                               # (S, H)
        onehot = sel.astype(x_blk.dtype)                               # native dtype for MXU
        out = jnp.dot(onehot, x_blk, preferred_element_type=jnp.float32)
        o_ref[0] = out.astype(o_ref.dtype)

    return kernel


def length_regulator_forward(x, duration, max_len, *, t_tile=128):
    """LengthRegulator.forward: (x, duration, max_len) -> (expanded, mel_len).

    x:        (B, S, H) encoder output.
    duration: (B, S) integer durations.
    max_len:  static python int (output time length).
    """
    # TODO(synk): max_len=None (pad to the dynamic max mel_len) needs a
    # data-dependent output shape, which JAX/Pallas cannot express; callers
    # must pass a static max_len. Frames beyond max_len are truncated.
    assert max_len is not None and isinstance(max_len, int)

    b, s, h = x.shape
    duration = duration.astype(jnp.int32)

    # Tiny glue: inclusive cumsum of durations + mel lengths.
    cum = jnp.cumsum(duration, axis=1)          # (B, S) int32
    mel_len = cum[:, -1]                        # (B,)   int32

    # Time tile: multiple of 8 sublanes, capped at the requested tile size.
    tt = max(8, min(_ceil_to(t_tile, 8), _ceil_to(max_len, 8)))
    t_pad = _ceil_to(max_len, tt)
    num_t = t_pad // tt

    # Keep the per-batch scalar rows as (1, 1, S) so block dims equal full
    # array dims (satisfies the (8, 128) tiling rule for small S).
    cum3 = cum[:, None, :]                      # (B, 1, S)
    dur3 = duration[:, None, :]                 # (B, 1, S)

    kernel = _make_length_regulator_kernel(tt, s)

    out_padded = pl.pallas_call(
        kernel,
        out_shape=jax.ShapeDtypeStruct((b, t_pad, h), x.dtype),
        grid_spec=pltpu.PrefetchScalarGridSpec(
            num_scalar_prefetch=0,
            grid=(b, num_t),
            in_specs=[
                pl.BlockSpec((1, 1, s), lambda bi, ti: (bi, 0, 0)),
                pl.BlockSpec((1, 1, s), lambda bi, ti: (bi, 0, 0)),
                pl.BlockSpec((1, s, h), lambda bi, ti: (bi, 0, 0)),
            ],
            out_specs=pl.BlockSpec((1, tt, h), lambda bi, ti: (bi, ti, 0)),
        ),
        compiler_params=pltpu.CompilerParams(
            dimension_semantics=("parallel", "parallel")),
    )(cum3, dur3, x)

    return out_padded[:, :max_len, :], mel_len


def variance_adaptor_forward(x, src_mask, mel_mask, duration_target,
                             pitch_target, max_len, *, log_offset=1.0,
                             t_tile=128):
    """VarianceAdaptor.forward: returns (expanded_x, mel_len, mel_mask)."""
    del src_mask, pitch_target, log_offset  # unused in the reference forward
    out, mel_len = length_regulator_forward(
        x, duration_target, max_len, t_tile=t_tile)
    return out, mel_len, mel_mask


def _lr_reference_numpy(x, duration, max_len):
    """Pure numpy re-implementation of LengthRegulator.LR (repeat + pad)."""
    x = np.asarray(x)
    duration = np.asarray(duration)
    b, _, h = x.shape
    out = np.zeros((b, max_len, h), dtype=x.dtype)
    mel_len = np.zeros((b,), dtype=np.int32)
    for i in range(b):
        rows = np.repeat(x[i], duration[i], axis=0)
        mel_len[i] = rows.shape[0]
        out[i, :rows.shape[0], :] = rows[:max_len]
    return out, mel_len


if __name__ == "__main__":
    # Small shapes consistent with the module: batch=2, src seq=8, hidden=32.
    B, S, H = 2, 8, 32

    key = jax.random.PRNGKey(0)
    kx, kd = jax.random.split(key, 2)

    x = jax.random.normal(kx, (B, S, H), dtype=jnp.float32)
    duration = jax.random.randint(kd, (B, S), 0, 5, dtype=jnp.int32)

    # Static max_len (here: the true max mel length, as in training).
    max_len = int(jnp.max(jnp.sum(duration, axis=1)))

    # mel_mask (passed through unchanged by the forward).
    mel_len_np = np.asarray(jnp.sum(duration, axis=1))
    mel_mask = (np.arange(max_len)[None, :] < mel_len_np[:, None])
    mel_mask = jnp.asarray(mel_mask)
    src_mask = jnp.zeros((B, S), dtype=jnp.bool_)
    pitch_target = jnp.zeros((B, max_len), dtype=jnp.float32)

    out, mel_len, mel_mask_out = variance_adaptor_forward(
        x, src_mask, mel_mask, duration, pitch_target, max_len, t_tile=8)
    out = jax.block_until_ready(out)
    mel_len = jax.block_until_ready(mel_len)

    ref_out, ref_mel_len = _lr_reference_numpy(x, duration, max_len)

    assert out.shape == (B, max_len, H), out.shape
    assert np.array_equal(np.asarray(mel_len), ref_mel_len), "mel_len mismatch"
    assert np.allclose(np.asarray(out), ref_out, atol=1e-5, rtol=1e-5), \
        "mismatch vs. reference length regulator"
    assert np.array_equal(np.asarray(mel_mask_out), np.asarray(mel_mask)), \
        "mel_mask passthrough mismatch"

    print("KERNEL_OK")
</pallas_src>

<mosaic_0001>
module attributes {stable_mosaic.version = 11 : i64} {
  func.func @kernel(%arg0: i32, %arg1: i32, %arg2: memref<1x1x8xi32, #tpu.memory_space<vmem>>, %arg3: memref<1x1x8xi32, #tpu.memory_space<vmem>>, %arg4: memref<1x8x32xf32, #tpu.memory_space<vmem>>, %arg5: memref<1x8x32xf32, #tpu.memory_space<vmem>>) attributes {dimension_semantics = [#tpu.dimension_semantics<parallel>, #tpu.dimension_semantics<parallel>], iteration_bounds = array<i64: 2, 2>, scalar_prefetch = 0 : i64, scratch_operands = 0 : i64, tpu.core_type = #tpu.core_type<tc>, window_params = [{transform_indices = @transform_0, window_bounds = array<i64: 1, 1, 8>}, {transform_indices = @transform_1, window_bounds = array<i64: 1, 1, 8>}, {transform_indices = @transform_2, window_bounds = array<i64: 1, 8, 32>}, {transform_indices = @transform_3, window_bounds = array<i64: 1, 8, 32>}]} {
    %c8_i32 = arith.constant 8 : i32
    %0 = arith.muli %arg1, %c8_i32 : i32
    %1 = tpu.iota {dimensions = array<i32: 0>} : vector<8x8xi32>
    %2 = vector.broadcast %0 : i32 to vector<8x8xi32>
    %3 = arith.addi %2, %1 : vector<8x8xi32>
    %c0 = arith.constant 0 : index
    %c0_0 = arith.constant 0 : index
    %c0_1 = arith.constant 0 : index
    %4 = vector.load %arg2[%c0, %c0_0, %c0_1] : memref<1x1x8xi32, #tpu.memory_space<vmem>>, vector<1x1x8xi32>
    %5 = vector.shape_cast %4 : vector<1x1x8xi32> to vector<1x8xi32>
    %c0_2 = arith.constant 0 : index
    %c0_3 = arith.constant 0 : index
    %c0_4 = arith.constant 0 : index
    %6 = vector.load %arg3[%c0_2, %c0_3, %c0_4] : memref<1x1x8xi32, #tpu.memory_space<vmem>>, vector<1x1x8xi32>
    %7 = vector.shape_cast %6 : vector<1x1x8xi32> to vector<1x8xi32>
    %8 = arith.subi %5, %7 : vector<1x8xi32>
    %9 = vector.broadcast %8 : vector<1x8xi32> to vector<8x8xi32>
    %10 = arith.cmpi sge, %3, %9 : vector<8x8xi32>
    %11 = vector.broadcast %5 : vector<1x8xi32> to vector<8x8xi32>
    %12 = arith.cmpi slt, %3, %11 : vector<8x8xi32>
    %13 = arith.andi %10, %12 : vector<8x8xi1>
    %c0_5 = arith.constant 0 : index
    %c0_6 = arith.constant 0 : index
    %c0_7 = arith.constant 0 : index
    %14 = vector.load %arg4[%c0_5, %c0_6, %c0_7] : memref<1x8x32xf32, #tpu.memory_space<vmem>>, vector<1x8x32xf32>
    %15 = vector.shape_cast %14 : vector<1x8x32xf32> to vector<8x32xf32>
    %16 = arith.extui %13 : vector<8x8xi1> to vector<8x8xi32>
    %17 = arith.sitofp %16 : vector<8x8xi32> to vector<8x8xf32>
    %cst = arith.constant dense<0.000000e+00> : vector<8x32xf32>
    %18 = tpu.matmul %17, %15, %cst {dimension_numbers = #tpu.dot_dimension_numbers<[1], [0], [0], [1], [0, 0, 1, 1], [], []>} : vector<8x8xf32>, vector<8x32xf32>, vector<8x32xf32> -> vector<8x32xf32>
    %c0_8 = arith.constant 0 : index
    %c0_9 = arith.constant 0 : index
    %c0_10 = arith.constant 0 : index
    %19 = vector.load %arg5[%c0_8, %c0_9, %c0_10] : memref<1x8x32xf32, #tpu.memory_space<vmem>>, vector<1x8x32xf32>
    %20 = vector.shape_cast %19 : vector<1x8x32xf32> to vector<8x32xf32>
    %21 = vector.shape_cast %18 : vector<8x32xf32> to vector<1x8x32xf32>
    tpu.vector_store %arg5[%c0_8, %c0_9, %c0_10], %21 {strides = array<i32>} : memref<1x8x32xf32, #tpu.memory_space<vmem>>, vector<1x8x32xf32>,
    return
  }
  func.func @transform_0(%arg0: i32, %arg1: i32) -> (i32, i32, i32) {
    %c0_i32 = arith.constant 0 : i32
    %c0_i32_0 = arith.constant 0 : i32
    %c0_i32_1 = arith.constant 0 : i32
    return %arg0, %c0_i32, %c0_i32_0 : i32, i32, i32
  }
  func.func @transform_1(%arg0: i32, %arg1: i32) -> (i32, i32, i32) {
    %c0_i32 = arith.constant 0 : i32
    %c0_i32_0 = arith.constant 0 : i32
    %c0_i32_1 = arith.constant 0 : i32
    return %arg0, %c0_i32, %c0_i32_0 : i32, i32, i32
  }
  func.func @transform_2(%arg0: i32, %arg1: i32) -> (i32, i32, i32) {
    %c0_i32 = arith.constant 0 : i32
    %c0_i32_0 = arith.constant 0 : i32
    %c0_i32_1 = arith.constant 0 : i32
    return %arg0, %c0_i32, %c0_i32_0 : i32, i32, i32
  }
  func.func @transform_3(%arg0: i32, %arg1: i32) -> (i32, i32, i32) {
    %c0_i32 = arith.constant 0 : i32
    %c0_i32_0 = arith.constant 0 : i32
    return %arg0, %arg1, %c0_i32 : i32, i32, i32
  }
}

</mosaic_0001>

<bundles_post_ra>
// kernel: tpu_custom_call.1
= control target key start
LH: loop header
LB: loop body
LE: loop exit
PB: predicated region body
PF: predicated region fallthrough
CT: control target
= control target key end

     0   :  { %s1112_s0 = inlined_call_operand.hbm [shape: s32[2,1,8], index: 0, kind: input, shape index: {}]   ;;  %s1113_s1 = inlined_call_operand.hbm [shape: s32[2,1,8], index: 1, kind: input, shape index: {}]   ;;  %s1114_s2 = inlined_call_operand.hbm [shape: f32[2,8,32], index: 2, kind: input, shape index: {}]   ;;  %s1115_s3 = inlined_call_operand.hbm [shape: f32[2,16,32], index: 3, kind: output, shape index: {}]  }
   0x1   :  { %1120 = sst [smem:[#allocation18_spill]] %s1112_s0 }
   0x2   :  { %1121 = sst [smem:[#allocation19_spill]] %s1113_s1 }
   0x3   :  { %8 = vsyncpa [#allocation3], 0 }
   0x4   :  { %10 = vsyncpa [#allocation3 + $0x1], 0 }
   0x5   :  { %11 = vsyncpa [#allocation6], 0 }
   0x6   :  { %13 = vsyncpa [#allocation6 + $0x1], 0 }
   0x7   :  { %14 = vsyncpa [#allocation4], 0 }
   0x8   :  { %16 = vsyncpa [#allocation4 + $0x1], 0  ;;  %s875_s12 = smov 0   ;;  %s877_s13 = smov 0  }
   0x9   :  { %s879_s14 = smov 0   ;;  %s881_s15 = smov 0  }
   0xa   :  { %s883_s16 = smov 0   ;;  %s885_s17 = smov 0  }
   0xb   :  { %s887_s18 = smov 0   ;;  %s889_s19 = smov 0  }
   0xc   :  { %s891_s20 = smov 0   ;;  %s893_s21 = smov 0  }
   0xd   :  { %s895_s22 = smov 0  }
   0xe LB: > { %1122 = sst [smem:[#allocation12_spill]] %s827_s17  ;;  %s929_s23 = sadd.s32 4294967295, %s847_s22   ;;  %s847_s22 = sphi %s895_s22, %s22_s22   ;;  %s843_s21 = sphi %s893_s21, %s1149_s21   ;;  %s839_s20 = sphi %s891_s20, %s1140_s20   ;;  %s835_s19 = sphi %s889_s19, %s1148_s19   ;;  %s831_s18 = sphi %s887_s18, %s1139_s18   ;;  %s827_s17 = sphi %s885_s17, %s1147_s17   ;;  %s823_s16 = sphi %s883_s16, %s1146_s16   ;;  %s819_s15 = sphi %s881_s15, %s1145_s15   ;;  %s815_s14 = sphi %s879_s14, %s1144_s14   ;;  %s811_s13 = sphi %s877_s13, %s1143_s13   ;;  %s807_s12 = sphi %s875_s12, %s1142_s12  }
   0xf   : > { %1123 = sst [smem:[#allocation13_spill]] %s839_s20  ;;  %s500_s24 = sadd.s32 4294967294, %s847_s22  }
  0x10   : > { %s31_s25 = sadd.s32 1, %s839_s20  ;;  %s34_s26 = sadd.s32 1, %s843_s21 }
  0x11   : > { %p32_p0 = scmp.ge.s32.totalorder %s31_s25, 2  ;;  %s41_s27 = sadd.s32 1, %s827_s17 }
  0x12   : > { %p48_p1 = scmp.ne.s32.totalorder %s827_s17, %s823_s16  ;;  %p49_p2 = scmp.eq.s32.totalorder %s847_s22, 0 }
  0x13   : > { %s1151_s25 = smov (%p32_p0, %s31_s25), 0  ;;  %s1153_s26 = smov (!%p32_p0, %s34_s26), %s843_s21 }
  0x14   : > { %1124 = sst [smem:[#allocation14_spill]] %s1151_s25  ;;  %p941_p3 = por %p49_p2, %p48_p1 }
  0x15   : > { %p54_p4 = scmp.ne.s32.totalorder %s823_s16, %s819_s15  ;;  %p36_p5 = scmp.ge.s32.totalorder %s1153_s26, 2 }
  0x16   : > { %p55_p6 = scmp.eq.s32.totalorder %s929_s23, 0  ;;  %s117_s29 = ssub.s32 %s839_s20, %s1151_s25 }
  0x17   : > { %s121_s30 = sadd.s32 1, %s815_s14  ;;  %s1155_s26 = smov (%p36_p5, %s1153_s26), 0 }
  0x18   : > { %1126 = sst [smem:[#allocation15_spill]] %s1155_s26  ;;  %p952_p7 = por %p55_p6, %p54_p4 }
  0x19   : > { %p131_p8 = scmp.ne.s32.totalorder %s815_s14, %s811_s13  ;;  %s38_s5 = ssub.s32 %s843_s21, %s1155_s26 }
  0x1a   : > { %p132_p9 = scmp.eq.s32.totalorder %s929_s23, 3  ;;  %p39_p10 = scmp.eq.s32.totalorder %s38_s5, 0 }
  0x1b   : > { %s118_s6 = sor.u32 %s117_s29, %s38_s5  ;;  %p137_p13 = scmp.ne.s32.totalorder %s811_s13, %s807_s12 }
  0x1c   : > { %p119_p11 = scmp.eq.s32.totalorder %s118_s6, 0  ;;  %p961_p12 = por %p132_p9, %p131_p8 }
  0x1d   : > { %s966_s8 = scalar_select %p39_p10, %s827_s17, %s41_s27  }
  0x1e   : > { %s969_s9 = scalar_select %p119_p11, %s815_s14, %s121_s30  }
  0x1f   : > { %1129 = sst [smem:[#allocation16_spill]] %s966_s8  ;;  %p138_p0 = scmp.eq.s32.totalorder %s500_s24, 3 }
  0x20   : > { %1130 = sst [smem:[#allocation17_spill]] %s969_s9  ;;  %p547_p1 = scmp.lt.s32.totalorder %s847_s22, 4 }
  0x21   : > { %p974_p2 = por %p138_p0, %p137_p13  ;;  %s979_s11 = sand.u32 1, %s827_s17  }
  0x22   : > { %s503_s15 = sshll.u32 %s843_s21, 4  ;;  %p984_p4 = pnand %p547_p1, %p941_p3 }
  0x23   : > { %s175_s27 = sand.u32 1, %s847_s22   ;;  %s1133_s1 = sld [smem:[#allocation19_spill]] }
  0x24   : > { %s178_s6 = scalar_lea.vmem [#allocation5], %s979_s11  ;;  %p507_p5 = scmp.ge.s32.totalorder %s847_s22, 1 }
  0x25   : > { %s185_s26 = sshll.u32 %s178_s6, 4  ;;  %s994_s25 = scalar_lea.sflag [#allocation6], %s175_s27  ;;  %s186_s26 = int_to_ptr.vmem [resolvable:$true] %s185_s26 }
  0x26   : > { %p641_p6 = pneg %p984_p4  ;;  %s652_s28 = scalar_lea.vmem %s186_s26, 16 }
  0x27   : > { %p653_p3 = scmp.ne.s32.totalorder %s186_s26, %s652_s28  ;;  %s849_s20 = smov [#allocation5]  }
  0x28   : > { %s657_s8 = sshll.u32 %s849_s20, 4  ;;  %s658_s8 = int_to_ptr.vmem [resolvable:$false] %s657_s8 }
  0x29   : > { %s183_s24 = scalar_lea.hbm %s1133_s1, %s503_s15  ;;  %p655_p8 = pnand %p653_p3, %p641_p6 }
  0x2a   : > { %s659_s17 = scalar_lea.vmem %s658_s8, 32  ;;  %p660_p10 = scmp.lt.s32.totalorder %s186_s26, %s658_s8 }
  0x2b   : > { %p656_p9 = pneg %p655_p8  ;;  %p661_p11 = scmp.lt.s32.totalorder %s659_s17, %s652_s28 }
  0x2d   : > { %p662_p13 = por %p661_p11, %p660_p10 }
  0x2f   : > { %p663_p0 = pnand %p662_p13, %p656_p9 }
  0x31   : > { %666 = shalt.err (!%p663_p0)
}
  0x32   : > { %539 = dma.hbm_to_vmem [thread:$0]  (!%p984_p4), %s183_s24, 16, %s186_s26, %s994_s25  }
  0x33   : > { %p208_p1 = scmp.lt.s32.totalorder %s847_s22, 5  ;;  %s1135_s0 = sld [smem:[#allocation18_spill]] }
  0x34   : > { %s161_s30 = scalar_lea.vmem [#allocation2], %s979_s11  ;;  %s505_s6 = sshll.u32 %s979_s11, 3 }
  0x35   : > { %p1007_p3 = pnand %p507_p5, %p208_p1  ;;  %s168_s5 = sshll.u32 %s161_s30, 4  ;;  %s169_s5 = int_to_ptr.vmem [resolvable:$true] %s168_s5 }
  0x36   : > { %s159_s28 = scalar_lea.sflag [#allocation3], %s979_s11  ;;  %s680_s1 = scalar_lea.vmem %s169_s5, 16 }
  0x37   : > { %p681_p8 = scmp.ne.s32.totalorder %s169_s5, %s680_s1  ;;  %s850_s26 = smov [#allocation2]  }
  0x38   : > { %s685_s24 = sshll.u32 %s850_s26, 4  ;;  %s686_s24 = int_to_ptr.vmem [resolvable:$false] %s685_s24 }
  0x39   : > { %s166_s27 = scalar_lea.hbm %s1135_s0, %s503_s15  ;;  %p683_p9 = pnand %p681_p8, %p641_p6 }
  0x3a   : > { %s687_s9 = scalar_lea.vmem %s686_s24, 32  ;;  %p688_p5 = scmp.lt.s32.totalorder %s169_s5, %s686_s24 }
  0x3b   : > { %p684_p10 = pneg %p683_p9  ;;  %p689_p11 = scmp.lt.s32.totalorder %s687_s9, %s680_s1 }
  0x3d   : > { %p690_p13 = por %p689_p11, %p688_p5 }
  0x3f   : > { %p691_p0 = pnand %p690_p13, %p684_p10 }
  0x41   : > { %694 = shalt.err (!%p691_p0)
}
  0x42   : > { %536 = dma.hbm_to_vmem [thread:$0]  (!%p984_p4), %s166_s27, 16, %s169_s5, %s159_s28  }
  0x43   : > { %s506_s11 = sshll.u32 %s843_s21, 7  ;;  %s196_s30 = scalar_lea.vmem [#allocation7], %s505_s6 }
  0x44   : > { %s201_s8 = scalar_lea.hbm %s1114_s2, %s506_s11  ;;  %s203_s0 = sshll.u32 %s196_s30, 4  ;;  %s204_s0 = int_to_ptr.vmem [resolvable:$true] %s203_s0 }
  0x45   : > { %s708_s26 = scalar_lea.vmem %s204_s0, 128  ;;  %s851_s1 = smov [#allocation7]  }
  0x46   : > { %p709_p1 = scmp.ne.s32.totalorder %s204_s0, %s708_s26  ;;  %s713_s9 = sshll.u32 %s851_s1, 4  ;;  %s714_s9 = int_to_ptr.vmem [resolvable:$false] %s713_s9 }
  0x47   : > { %s715_s24 = scalar_lea.vmem %s714_s9, 256  ;;  %p716_p10 = scmp.lt.s32.totalorder %s204_s0, %s714_s9 }
  0x48   : > { %p711_p8 = pnand %p709_p1, %p641_p6  ;;  %p717_p5 = scmp.lt.s32.totalorder %s715_s24, %s708_s26 }
  0x4a   : > { %p712_p9 = pneg %p711_p8  ;;  %p718_p11 = por %p717_p5, %p716_p10 }
  0x4c   : > { %p719_p13 = pnand %p718_p11, %p712_p9 }
  0x4e   : > { %722 = shalt.err (!%p719_p13)
}
  0x4f   : > { %542 = dma.hbm_to_vmem [thread:$0]  (!%p984_p4), %s201_s8, 128, %s204_s0, %s994_s25  }
  0x50   : > { %212 = sbr.rel (%p1007_p3) target bundleno = 307 (0x133), region = 32  ;;  %s214_s27 = sand.u32 (!%p1007_p3), 1, %s823_s16  }
  0x51   : > { %s215_s5 = scalar_lea.sflag (!%p1007_p3), [#allocation3], %s214_s27  ;;  %s217_s6 = scalar_lea.vmem (!%p1007_p3), [#allocation2], %s214_s27 }
  0x55   : > { %794 = dma.done.wait (%p952_p7), %s215_s5, 16  }
  0x56   : > { %796 = vsyncadd (%p952_p7), %s215_s5, 4294967280  ;;  %s222_s28 = sand.u32 1, %s929_s23   ;;  %s225_s29 = scalar_lea.vmem [#allocation5], %s214_s27 }
  0x57   : > { %s223_s11 = scalar_lea.sflag [#allocation6], %s222_s28 }
  0x58   : > { %798 = dma.done.wait (%p952_p7), %s223_s11, 144  }
  0x59   : > { %800 = vsyncadd (%p952_p7), %s223_s11, 4294967152  ;;  %s510_s0 = sshll.u32 %s831_s18, 3  ;;  %v266_v0 = vlaneseq  ;;  %v852_v1 = vmov 0.0   ;;  %s508_s25 = sshll.u32 %s214_s27, 3  ;;  %vm853_vm0 = vmmov 0   ;;  %vm287_vm3 = vcmask 64512  }
  0x5a   : > { %520 = vmatprep.subr.mxu0 %v852_v1  ;;  %522 = vmatprep.mubr.msk.f32.mxu0 %vm853_vm0, %v852_v1  ;;  %v268_v3 = vstv %s510_s0  ;;  %s234_s23 = scalar_lea.vmem [#allocation7], %s508_s25  ;;  %v270_v7 = vld [vmem:[%s217_s6] sm:$0x1]  ;;  %s262_s4 = sand.u32 1, %s811_s13   ;;  %vm361_vm5 = vcmask 261120  }
  0x5b   : > { %v267_v2 = vshrl.u32 %v266_v0, 7  ;;  %v284_v6 = vld [vmem:[%s234_s23] sm:$0xff]  ;;  %v271_v8 = vld [vmem:[%s225_s29] sm:$0x1]  ;;  %s509_s20 = sshll.u32 %s262_s4, 3  ;;  %s514_s15 = sshll.u32 %s835_s19, 1 }
  0x5c   : > { %521 = vmatpush3.msra.mxu0 %v284_v6  ;;  %v272_v9 = vsub.s32 %v270_v7, %v271_v8  ;;  %s375_s17 = sadd.s32 %s831_s18, %s514_s15  ;;  %s264_s30 = scalar_lea.vmem [#allocation8], %s509_s20 }
  0x5d   : > { %v275_v4 = vsub.s32 0, %v267_v2  ;;  %v269_v5 = vadd.s32 %v268_v3, %v267_v2  ;;  %s515_s8 = sshll.u32 %s375_s17, 7  ;;  %s379_s26 = sshll.u32 %s264_s30, 4  ;;  %s1053_s26 = int_to_ptr.vmem [resolvable:$true] %s379_s26 }
  0x5e   : > { %s1051_s24 = scalar_lea.hbm %s1115_s3, %s515_s8  ;;  %s364_s27 = scalar_lea.sflag [#allocation4], %s262_s4 }
  0x5f   : > { %v281_v10 = vrot.slane %v270_v7, %v275_v4  ;;  %v276_v11 = vrot.slane %v272_v9, %v275_v4  ;;  %s723_s19 = scalar_lea.vmem %s1053_s26, 128  ;;  %s854_s18 = smov [#allocation8]  }
  0x60   : > { %p724_p7 = scmp.ne.s32.totalorder %s1053_s26, %s723_s19  ;;  %s727_s5 = sshll.u32 %s854_s18, 4  ;;  %s728_s5 = int_to_ptr.vmem [resolvable:$false] %s727_s5 }
  0x61   : > { %vm282_vm1 = vcmp.lt.s32.totalorder %v269_v5, %v281_v10  ;;  %vm277_vm2 = vcmp.ge.s32.totalorder %v269_v5, %v276_v11  ;;  %s729_s6 = scalar_lea.vmem %s728_s5, 256  ;;  %p730_p3 = scmp.lt.s32.totalorder %s1053_s26, %s728_s5 }
  0x62   : > { %vm283_vm4 = vmand %vm277_vm2, %vm282_vm1  ;;  %p725_p4 = pnand %p724_p7, %p961_p12  ;;  %p731_p0 = scmp.lt.s32.totalorder %s729_s6, %s723_s19 }
  0x63   : > { %v511_v12 = vsel %vm283_vm4, 1.0, %v852_v1 }
  0x64   : > { %523 = vmatmul.mubr.msk.f32.vlgmr.msra.gmra.mxu0 %vm287_vm3, %v511_v12  ;;  %p726_p6 = pneg %p725_p4  ;;  %p732_p1 = por %p731_p0, %p730_p3 }
  0x66   : > { %p733_p8 = pnand %p732_p1, %p726_p6 }
 0x124   : > { %v357_v13 = vpop.f32.mrf.mxu0 }
 0x125   : > { %362 = vst.msk [vmem:[%s264_s30] sm:$0xff] %vm361_vm5, %v357_v13 }
 0x126   : > { %v524_v14 = vpop.f32.mrf.mxu0 }
 0x127   : > { %736 = shalt.err (!%p733_p8)
}
 0x128   : > { %s737_s28 = scalar_lea.hbm %s1051_s24, 128  ;;  %s741_s0 = scalar_lea.hbm %s1115_s3, 512 }
 0x129   : > { %p738_p9 = scmp.ne.s32.totalorder %s1051_s24, %s737_s28  ;;  %p742_p11 = scmp.lt.s32.totalorder %s1051_s24, %s1115_s3 }
 0x12a   : > { %p743_p13 = scmp.lt.s32.totalorder %s741_s0, %s737_s28 }
 0x12b   : > { %p739_p10 = pnand %p738_p9, %p961_p12 }
 0x12c   : > { %p744_p7 = por %p743_p13, %p742_p11 }
 0x12d   : > { %p740_p5 = pneg %p739_p10 }
 0x12f   : > { %p745_p4 = pnand %p744_p7, %p740_p5 }
 0x131   : > { %748 = shalt.err (!%p745_p4)
}
 0x132   : > { %531 = dma.vmem_to_hbm [thread:$0]  (%p961_p12), %s1053_s26, 128, %s1051_s24, %s364_s27  }
 0x133 PF: > { %p548_p6 = scmp.ge.s32.totalorder %s847_s22, 2  ;;  %s391_s4 = sand.u32 1, %s807_s12  }
 0x134   : > { %s392_s20 = scalar_lea.sflag [#allocation4], %s391_s4 }
 0x135   : > { %p544_p3 = pnand %p548_p6, %p974_p2 }
 0x137   : > { %p545_p0 = pneg %p544_p3 }
 0x139   : > { %802 = dma.done.wait (%p545_p0), %s392_s20, 128  }
 0x13a   : > { %804 = vsyncadd (%p545_p0), %s392_s20, 4294967168  ;;  %s22_s22 = sadd.s32 1, %s847_s22   ;;  %s1136_s7 = sld [smem:[#allocation17_spill]] }
 0x13b   : > { %p19_p1 = scmp.ge.s32.totalorder %s22_s22, 6   ;;  %s1137_s17 = sld [smem:[#allocation12_spill]] }
 0x13c   : > { %s1138_s8 = sld [smem:[#allocation16_spill]]  ;;  %s1142_s12 = smov %s811_s13 }
 0x13d   : > { %s1139_s18 = sld [smem:[#allocation13_spill]]  ;;  %s1143_s13 = smov %s815_s14 }
 0x13e   : > { %s1140_s20 = sld [smem:[#allocation14_spill]]  ;;  %s1145_s15 = smov %s823_s16 }
 0x13f   : > { %s1141_s30 = sld [smem:[#allocation15_spill]]  ;;  %s1148_s19 = smov %s843_s21 }
 0x140   : > { %s1144_s14 = smov %s1136_s7 }
 0x141   : > { %s1146_s16 = smov %s1137_s17  ;;  %21 = sbr.rel (!%p19_p1) target bundleno = 14 (0xe), region = 101 }
 0x142   : > { %s1147_s17 = smov %s1138_s8 }
 0x145   : > { %s1149_s21 = smov %s1141_s30 }
 0x146   :  { %397 = vsyncpa [#allocation3], 1 }
 0x147   :  { %399 = vsyncpa [#allocation3 + $0x1], 1 }
 0x148   :  { %400 = vsyncpa [#allocation6], 1 }
 0x149   :  { %402 = vsyncpa [#allocation6 + $0x1], 1 }
 0x14a   :  { %403 = vsyncpa [#allocation4], 1 }
 0x14b   :  { %405 = vsyncpa [#allocation4 + $0x1], 1 }

</bundles_post_ra>
